<compile_context>
chip_gen: v6e
topology: v6e:2x2x1
jax: 0.10.0
libtpu: 0.0.40
codegen_flags: <defaults>
</compile_context>

<pallas_src>
import jax
import jax.numpy as jnp
from jax.experimental import pallas as pl
from jax.experimental.pallas import tpu as pltpu

NEG_SLOPE = 0.01  # torch.nn.LeakyReLU default negative_slope

# Padded (lane-dense) widths.
D_IN_P = 8     # 6  -> 8   (sublane-friendly input width)
H1_P = 128     # 100 -> 128
H2_P = 128     # 50  -> 128
D_OUT_P = 128  # 6   -> 128 (sliced back to 6 in the wrapper)

D_IN, H1, H2, D_OUT = 6, 100, 50, 6


def _leaky_relu(x):
    return jnp.where(x > 0, x, NEG_SLOPE * x)


def mlp_kernel(x_ref, w1_ref, b1_ref, w2_ref, b2_ref, w3_ref, b3_ref, o_ref):
    x = x_ref[...]                                                             # (TB, 8)
    h1 = jnp.dot(x, w1_ref[...], preferred_element_type=jnp.float32) + b1_ref[...]
    h1 = _leaky_relu(h1)                                                       # (TB, 128)
    h2 = jnp.dot(h1, w2_ref[...], preferred_element_type=jnp.float32) + b2_ref[...]
    h2 = _leaky_relu(h2)                                                       # (TB, 128)
    y = jnp.dot(h2, w3_ref[...], preferred_element_type=jnp.float32) + b3_ref[...]
    o_ref[...] = y.astype(o_ref.dtype)                                         # (TB, 128)


def _round_up(n, m):
    return ((n + m - 1) // m) * m


def _pad2d(a, rows, cols):
    return jnp.pad(a, ((0, rows - a.shape[0]), (0, cols - a.shape[1])))


def net_forward(x, params, *, max_tile=512):
    """x: (B, 6) float32; params: dict of (in,out) weights and (1,out) biases
    in the *unpadded* sizes (6x100, 100x50, 50x6). Returns (B, 6) float32."""
    B = x.shape[0]

    # Batch tile: multiple of 8 sublanes, capped so VMEM stays small and
    # vreg pressure reasonable; pad the batch so it divides evenly.
    TB = min(max_tile, _round_up(B, 8))
    B_pad = _round_up(B, TB)
    grid = (B_pad // TB,)

    # Zero-pad operands to lane-dense shapes (zeros are exact pass-throughs).
    x_p = _pad2d(x.astype(jnp.float32), B_pad, D_IN_P)
    w1 = _pad2d(params["w1"], D_IN_P, H1_P)
    b1 = _pad2d(params["b1"], 1, H1_P)
    w2 = _pad2d(params["w2"], H1_P, H2_P)
    b2 = _pad2d(params["b2"], 1, H2_P)
    w3 = _pad2d(params["w3"], H2_P, D_OUT_P)
    b3 = _pad2d(params["b3"], 1, D_OUT_P)

    # Weights/biases: full block, constant index_map -> resident in VMEM
    # (no per-tile re-DMA). x/out: batch-tiled, double-buffered.
    resident = lambda a: pl.BlockSpec(a.shape, lambda i: (0, 0))

    flops = 2 * B * (D_IN * H1 + H1 * H2 + H2 * D_OUT)
    bytes_accessed = 4 * (
        B_pad * D_IN_P + B_pad * D_OUT_P
        + D_IN_P * H1_P + H1_P + H1_P * H2_P + H2_P + H2_P * D_OUT_P + D_OUT_P
    )

    y_pad = pl.pallas_call(
        mlp_kernel,
        out_shape=jax.ShapeDtypeStruct((B_pad, D_OUT_P), jnp.float32),
        grid=grid,
        in_specs=[
            pl.BlockSpec((TB, D_IN_P), lambda i: (i, 0)),
            resident(w1), resident(b1),
            resident(w2), resident(b2),
            resident(w3), resident(b3),
        ],
        out_specs=pl.BlockSpec((TB, D_OUT_P), lambda i: (i, 0)),
        compiler_params=pltpu.CompilerParams(
            dimension_semantics=("parallel",),
            vmem_limit_bytes=32 * 1024 * 1024,
        ),
        cost_estimate=pl.CostEstimate(
            flops=flops, transcendentals=0, bytes_accessed=bytes_accessed),
    )(x_p, w1, b1, w2, b2, w3, b3)

    return y_pad[:B, :D_OUT]


def init_params(key):
    """Deterministic init matching nn.Linear's U(-1/sqrt(in), 1/sqrt(in)) scheme.
    Weights stored transposed as (in_features, out_features), unpadded."""
    dims = [(D_IN, H1), (H1, H2), (H2, D_OUT)]
    params = {}
    for i, (fin, fout) in enumerate(dims, start=1):
        key, kw, kb = jax.random.split(key, 3)
        bound = 1.0 / jnp.sqrt(jnp.float32(fin))
        params[f"w{i}"] = jax.random.uniform(
            kw, (fin, fout), jnp.float32, minval=-bound, maxval=bound)
        params[f"b{i}"] = jax.random.uniform(
            kb, (1, fout), jnp.float32, minval=-bound, maxval=bound)
    return params


def reference_forward(x, params):
    h1 = _leaky_relu(x @ params["w1"] + params["b1"])
    h2 = _leaky_relu(h1 @ params["w2"] + params["b2"])
    return h2 @ params["w3"] + params["b3"]


if __name__ == "__main__":
    key = jax.random.PRNGKey(0)
    kp, kx, kx2 = jax.random.split(key, 3)
    params = init_params(kp)

    # Small synthetic batch of 6-D pose vectors (stand-in for data/trainPose.npy rows).
    batch = 8
    x = jax.random.normal(kx, (batch, D_IN), jnp.float32)

    y = net_forward(x, params)
    y = jax.block_until_ready(y)
    y_ref = reference_forward(x, params)
    assert y.shape == (batch, D_OUT)
    assert jnp.allclose(y, y_ref, atol=1e-5, rtol=1e-5), "mismatch vs JAX reference"

    # Ragged batch (exercises batch padding + tiling path).
    x2 = jax.random.normal(kx2, (37, D_IN), jnp.float32)
    y2 = jax.block_until_ready(net_forward(x2, params))
    y2_ref = reference_forward(x2, params)
    assert y2.shape == (37, D_OUT)
    assert jnp.allclose(y2, y2_ref, atol=1e-5, rtol=1e-5), "mismatch vs JAX reference (ragged)"

    print("KERNEL_OK")
</pallas_src>

<mosaic_0001>
module attributes {stable_mosaic.version = 11 : i64} {
  func.func @mlp_kernel(%arg0: i32, %arg1: memref<8x8xf32, #tpu.memory_space<vmem>>, %arg2: memref<8x128xf32, #tpu.memory_space<vmem>>, %arg3: memref<1x128xf32, #tpu.memory_space<vmem>>, %arg4: memref<128x128xf32, #tpu.memory_space<vmem>>, %arg5: memref<1x128xf32, #tpu.memory_space<vmem>>, %arg6: memref<128x128xf32, #tpu.memory_space<vmem>>, %arg7: memref<1x128xf32, #tpu.memory_space<vmem>>, %arg8: memref<8x128xf32, #tpu.memory_space<vmem>>) attributes {dimension_semantics = [#tpu.dimension_semantics<parallel>], iteration_bounds = array<i64: 1>, scalar_prefetch = 0 : i64, scratch_operands = 0 : i64, tpu.core_type = #tpu.core_type<tc>, window_params = [{transform_indices = @transform_0, window_bounds = array<i64: 8, 8>}, {pipeline_mode = #tpu.pipeline_mode<synchronous>, transform_indices = @transform_1, window_bounds = array<i64: 8, 128>}, {pipeline_mode = #tpu.pipeline_mode<synchronous>, transform_indices = @transform_2, window_bounds = array<i64: 1, 128>}, {pipeline_mode = #tpu.pipeline_mode<synchronous>, transform_indices = @transform_3, window_bounds = array<i64: 128, 128>}, {pipeline_mode = #tpu.pipeline_mode<synchronous>, transform_indices = @transform_4, window_bounds = array<i64: 1, 128>}, {pipeline_mode = #tpu.pipeline_mode<synchronous>, transform_indices = @transform_5, window_bounds = array<i64: 128, 128>}, {pipeline_mode = #tpu.pipeline_mode<synchronous>, transform_indices = @transform_6, window_bounds = array<i64: 1, 128>}, {transform_indices = @transform_7, window_bounds = array<i64: 8, 128>}]} {
    %c0 = arith.constant 0 : index
    %c0_0 = arith.constant 0 : index
    %0 = vector.load %arg1[%c0, %c0_0] : memref<8x8xf32, #tpu.memory_space<vmem>>, vector<8x8xf32>
    %c0_1 = arith.constant 0 : index
    %c0_2 = arith.constant 0 : index
    %1 = vector.load %arg2[%c0_1, %c0_2] : memref<8x128xf32, #tpu.memory_space<vmem>>, vector<8x128xf32>
    %cst = arith.constant dense<0.000000e+00> : vector<8x128xf32>
    %2 = tpu.matmul %0, %1, %cst {dimension_numbers = #tpu.dot_dimension_numbers<[1], [0], [0], [1], [0, 0, 1, 1], [], []>} : vector<8x8xf32>, vector<8x128xf32>, vector<8x128xf32> -> vector<8x128xf32>
    %c0_3 = arith.constant 0 : index
    %c0_4 = arith.constant 0 : index
    %3 = vector.load %arg3[%c0_3, %c0_4] : memref<1x128xf32, #tpu.memory_space<vmem>>, vector<1x128xf32>
    %4 = vector.broadcast %3 : vector<1x128xf32> to vector<8x128xf32>
    %5 = arith.addf %2, %4 : vector<8x128xf32>
    %cst_5 = arith.constant 0.000000e+00 : f32
    %6 = vector.broadcast %cst_5 : f32 to vector<8x128xf32>
    %7 = arith.cmpf ogt, %5, %6 : vector<8x128xf32>
    %cst_6 = arith.constant 0.00999999977 : f32
    %8 = vector.broadcast %cst_6 : f32 to vector<8x128xf32>
    %9 = arith.mulf %8, %5 : vector<8x128xf32>
    %10 = arith.select %7, %5, %9 : vector<8x128xi1>, vector<8x128xf32>
    %c0_7 = arith.constant 0 : index
    %c0_8 = arith.constant 0 : index
    %11 = vector.load %arg4[%c0_7, %c0_8] : memref<128x128xf32, #tpu.memory_space<vmem>>, vector<128x128xf32>
    %cst_9 = arith.constant dense<0.000000e+00> : vector<8x128xf32>
    %12 = tpu.matmul %10, %11, %cst_9 {dimension_numbers = #tpu.dot_dimension_numbers<[1], [0], [0], [1], [0, 0, 1, 1], [], []>} : vector<8x128xf32>, vector<128x128xf32>, vector<8x128xf32> -> vector<8x128xf32>
    %c0_10 = arith.constant 0 : index
    %c0_11 = arith.constant 0 : index
    %13 = vector.load %arg5[%c0_10, %c0_11] : memref<1x128xf32, #tpu.memory_space<vmem>>, vector<1x128xf32>
    %14 = vector.broadcast %13 : vector<1x128xf32> to vector<8x128xf32>
    %15 = arith.addf %12, %14 : vector<8x128xf32>
    %cst_12 = arith.constant 0.000000e+00 : f32
    %16 = vector.broadcast %cst_12 : f32 to vector<8x128xf32>
    %17 = arith.cmpf ogt, %15, %16 : vector<8x128xf32>
    %cst_13 = arith.constant 0.00999999977 : f32
    %18 = vector.broadcast %cst_13 : f32 to vector<8x128xf32>
    %19 = arith.mulf %18, %15 : vector<8x128xf32>
    %20 = arith.select %17, %15, %19 : vector<8x128xi1>, vector<8x128xf32>
    %c0_14 = arith.constant 0 : index
    %c0_15 = arith.constant 0 : index
    %21 = vector.load %arg6[%c0_14, %c0_15] : memref<128x128xf32, #tpu.memory_space<vmem>>, vector<128x128xf32>
    %cst_16 = arith.constant dense<0.000000e+00> : vector<8x128xf32>
    %22 = tpu.matmul %20, %21, %cst_16 {dimension_numbers = #tpu.dot_dimension_numbers<[1], [0], [0], [1], [0, 0, 1, 1], [], []>} : vector<8x128xf32>, vector<128x128xf32>, vector<8x128xf32> -> vector<8x128xf32>
    %c0_17 = arith.constant 0 : index
    %c0_18 = arith.constant 0 : index
    %23 = vector.load %arg7[%c0_17, %c0_18] : memref<1x128xf32, #tpu.memory_space<vmem>>, vector<1x128xf32>
    %24 = vector.broadcast %23 : vector<1x128xf32> to vector<8x128xf32>
    %25 = arith.addf %22, %24 : vector<8x128xf32>
    %c0_19 = arith.constant 0 : index
    %c0_20 = arith.constant 0 : index
    %26 = vector.load %arg8[%c0_19, %c0_20] : memref<8x128xf32, #tpu.memory_space<vmem>>, vector<8x128xf32>
    tpu.vector_store %arg8[%c0_19, %c0_20], %25 {strides = array<i32>} : memref<8x128xf32, #tpu.memory_space<vmem>>, vector<8x128xf32>,
    return
  }
  func.func @transform_0(%arg0: i32) -> (i32, i32) {
    %c0_i32 = arith.constant 0 : i32
    %c0_i32_0 = arith.constant 0 : i32
    return %arg0, %c0_i32 : i32, i32
  }
  func.func @transform_1(%arg0: i32) -> (i32, i32) {
    %c0_i32 = arith.constant 0 : i32
    %c0_i32_0 = arith.constant 0 : i32
    %c0_i32_1 = arith.constant 0 : i32
    return %c0_i32, %c0_i32_0 : i32, i32
  }
  func.func @transform_2(%arg0: i32) -> (i32, i32) {
    %c0_i32 = arith.constant 0 : i32
    %c0_i32_0 = arith.constant 0 : i32
    %c0_i32_1 = arith.constant 0 : i32
    return %c0_i32, %c0_i32_0 : i32, i32
  }
  func.func @transform_3(%arg0: i32) -> (i32, i32) {
    %c0_i32 = arith.constant 0 : i32
    %c0_i32_0 = arith.constant 0 : i32
    %c0_i32_1 = arith.constant 0 : i32
    return %c0_i32, %c0_i32_0 : i32, i32
  }
  func.func @transform_4(%arg0: i32) -> (i32, i32) {
    %c0_i32 = arith.constant 0 : i32
    %c0_i32_0 = arith.constant 0 : i32
    %c0_i32_1 = arith.constant 0 : i32
    return %c0_i32, %c0_i32_0 : i32, i32
  }
  func.func @transform_5(%arg0: i32) -> (i32, i32) {
    %c0_i32 = arith.constant 0 : i32
    %c0_i32_0 = arith.constant 0 : i32
    %c0_i32_1 = arith.constant 0 : i32
    return %c0_i32, %c0_i32_0 : i32, i32
  }
  func.func @transform_6(%arg0: i32) -> (i32, i32) {
    %c0_i32 = arith.constant 0 : i32
    %c0_i32_0 = arith.constant 0 : i32
    %c0_i32_1 = arith.constant 0 : i32
    return %c0_i32, %c0_i32_0 : i32, i32
  }
  func.func @transform_7(%arg0: i32) -> (i32, i32) {
    %c0_i32 = arith.constant 0 : i32
    %c0_i32_0 = arith.constant 0 : i32
    return %arg0, %c0_i32 : i32, i32
  }
}

</mosaic_0001>

<bundles_post_ra>
// kernel: tpu_custom_call.1
= control target key start
LH: loop header
LB: loop body
LE: loop exit
PB: predicated region body
PF: predicated region fallthrough
CT: control target
= control target key end

     0   :  { %12 = vsyncpa [#allocation3], 0  ;;  %s715_s0 = inlined_call_operand.hbm [shape: f32[8,8], index: 0, kind: input, shape index: {}]   ;;  %s716_s1 = inlined_call_operand.hbm [shape: f32[8,128], index: 1, kind: input, shape index: {}]   ;;  %s717_s2 = inlined_call_operand.vmem [shape: f32[1,128], index: 2, kind: input, shape index: {}]   ;;  %s718_s3 = inlined_call_operand.hbm [shape: f32[128,128], index: 3, kind: input, shape index: {}]   ;;  %s719_s4 = inlined_call_operand.vmem [shape: f32[1,128], index: 4, kind: input, shape index: {}]   ;;  %s720_s5 = inlined_call_operand.hbm [shape: f32[128,128], index: 5, kind: input, shape index: {}]   ;;  %s721_s6 = inlined_call_operand.vmem [shape: f32[1,128], index: 6, kind: input, shape index: {}]   ;;  %s722_s7 = inlined_call_operand.hbm [shape: f32[8,128], index: 7, kind: output, shape index: {}]  }
   0x1   :  { %13 = vsyncpa [#allocation6], 0 }
   0x2   :  { %14 = vsyncpa [#allocation9], 0 }
   0x3   :  { %15 = vsyncpa [#allocation4], 0  ;;  %s603_s24 = smov [#allocation5]   ;;  %s604_s26 = smov [#allocation2]  }
   0x4   :  { %s32_s25 = sshll.u32 %s603_s24, 4  ;;  %s22_s27 = sshll.u32 %s604_s26, 4  ;;  %s33_s25 = int_to_ptr.vmem [resolvable:$true] %s32_s25  ;;  %s23_s27 = int_to_ptr.vmem [resolvable:$true] %s22_s27 }
   0x5   :  { %s503_s28 = scalar_lea.vmem %s33_s25, 128  ;;  %p508_p1 = scmp.lt.s32.totalorder %s33_s25, %s33_s25 }
   0x6   :  { %p504_p0 = scmp.ne.s32.totalorder %s33_s25, %s503_s28  ;;  %p509_p2 = scmp.lt.s32.totalorder %s503_s28, %s503_s28 }
   0x8   :  { %p510_p3 = por %p509_p2, %p508_p1 }
   0xa   :  { %p511_p4 = pnand %p510_p3, %p504_p0 }
   0xc   :  { %514 = shalt.err (!%p511_p4)
}
   0xd   :  { %35 = dma.hbm_to_vmem [thread:$0]  %s716_s1, 128, %s33_s25, [#allocation6]  }
   0xe   :  { %s523_s8 = scalar_lea.vmem %s23_s27, 128  ;;  %p528_p6 = scmp.lt.s32.totalorder %s23_s27, %s23_s27 }
   0xf   :  { %p524_p5 = scmp.ne.s32.totalorder %s23_s27, %s523_s8  ;;  %p529_p7 = scmp.lt.s32.totalorder %s523_s8, %s523_s8 }
  0x11   :  { %p530_p8 = por %p529_p7, %p528_p6 }
  0x13   :  { %p531_p9 = pnand %p530_p8, %p524_p5 }
  0x15   :  { %534 = shalt.err (!%p531_p9)
}
  0x16   :  { %25 = dma.hbm_to_vmem [thread:$0]  %s715_s0, 128, %s23_s27, [#allocation3]  }
  0x17   :  { %s605_s11 = smov [#allocation7]  }
  0x18   :  { %s43_s12 = sshll.u32 %s605_s11, 4  ;;  %s44_s12 = int_to_ptr.vmem [resolvable:$true] %s43_s12 }
  0x19   :  { %s543_s13 = scalar_lea.vmem %s44_s12, 2048  ;;  %p548_p11 = scmp.lt.s32.totalorder %s44_s12, %s44_s12 }
  0x1a   :  { %p544_p10 = scmp.ne.s32.totalorder %s44_s12, %s543_s13  ;;  %p549_p12 = scmp.lt.s32.totalorder %s543_s13, %s543_s13 }
  0x1c   :  { %p550_p13 = por %p549_p12, %p548_p11 }
  0x1e   :  { %p551_p0 = pnand %p550_p13, %p544_p10 }
  0x20   :  { %554 = shalt.err (!%p551_p0)
}
  0x21   :  { %s606_s1 = smov 128   ;;  %s607_s14 = smov 8  }
  0x22   :  { %49 = dma.hbm_to_vmem [thread:$0]  %s718_s3, 2048, %s44_s12, [#allocation6], %s606_s1, %s606_s1, %s607_s14  }
  0x23   :  { %s608_s17 = smov [#allocation8]  }
  0x24   :  { %s57_s18 = sshll.u32 %s608_s17, 4  ;;  %s58_s18 = int_to_ptr.vmem [resolvable:$true] %s57_s18 }
  0x25   :  { %s563_s0 = scalar_lea.vmem %s58_s18, 2048  ;;  %p568_p2 = scmp.lt.s32.totalorder %s58_s18, %s58_s18 }
  0x26   :  { %p564_p1 = scmp.ne.s32.totalorder %s58_s18, %s563_s0  ;;  %p569_p3 = scmp.lt.s32.totalorder %s563_s0, %s563_s0 }
  0x28   :  { %p570_p4 = por %p569_p3, %p568_p2 }
  0x2a   :  { %p571_p5 = pnand %p570_p4, %p564_p1 }
  0x2c   :  { %574 = shalt.err (!%p571_p5)
}
  0x2d   :  { %63 = dma.hbm_to_vmem [thread:$0]  %s720_s5, 2048, %s58_s18, [#allocation9], %s606_s1, %s606_s1, %s607_s14  }
  0x2e   :  { %595 = dma.done.wait [#allocation3], 128  }
  0x2f   :  { %596 = vsyncadd [#allocation3], 4294967168 }
  0x30   :  { %597 = dma.done.wait [#allocation6], 2176  }
  0x31   :  { %598 = vsyncadd [#allocation6], 4294965120 }
  0x32   :  { %599 = dma.done.wait [#allocation9], 2048  }
  0x33   :  { %600 = vsyncadd [#allocation9], 4294965248  ;;  %v609_v0 = vmov 0.0   ;;  %vm610_vm0 = vmmov 0   ;;  %vm87_vm1 = vcmask 64512   ;;  %v79_v1 = vld [vmem:[#allocation5] sm:$0xff] }
  0x34   :  { %411 = vmatprep.subr.mxu0 %v609_v0  ;;  %413 = vmatprep.mubr.msk.f32.mxu0 %vm610_vm0, %v609_v0  ;;  %v78_v2 = vld [vmem:[#allocation2] sm:$0xff]  ;;  %v179_v3 = vld [vmem:[#allocation7 + $0x78] sm:$0xff]  ;;  %v177_v5 = vld [vmem:[#allocation7 + $0x68] sm:$0xff]  ;;  %s611_s24 = smov [#allocation10]  }
  0x35   :  { %416 = vmatprep.subr.mxu1 %v609_v0  ;;  %448 = vmatprep.mubr.msk.f32.mxu1 %vm610_vm0, %v609_v0  ;;  %v178_v4 = vld [vmem:[#allocation7 + $0x70] sm:$0xff]  ;;  %v176_v6 = vld [vmem:[#allocation7 + $0x60] sm:$0xff]  ;;  %v175_v7 = vld [vmem:[#allocation7 + $0x58] sm:$0xff]  ;;  %s360_s25 = sshll.u32 %s611_s24, 4  ;;  %s361_s25 = int_to_ptr.vmem [resolvable:$true] %s360_s25 }
  0x36   :  { %412 = vmatpush3.msra.mxu0 %v79_v1  ;;  %417 = vmatpush3.msra.mxu1 %v179_v3  ;;  %v174_v8 = vld [vmem:[#allocation7 + $0x50] sm:$0xff]  ;;  %v173_v9 = vld [vmem:[#allocation7 + $0x48] sm:$0xff]  ;;  %v172_v10 = vld [vmem:[#allocation7 + $0x40] sm:$0xff]  ;;  %s575_s26 = scalar_lea.vmem %s361_s25, 128  ;;  %p580_p7 = scmp.lt.s32.totalorder %s361_s25, %s361_s25 }
  0x37   :  { %414 = vmatmul.mubr.msk.f32.vlgmr.msra.gmra.mxu0 %vm87_vm1, %v78_v2  ;;  %418 = vmatprep.subr.mxu1 %v609_v0  ;;  %v171_v11 = vld [vmem:[#allocation7 + $0x38] sm:$0xff]  ;;  %v170_v12 = vld [vmem:[#allocation7 + $0x30] sm:$0xff]  ;;  %v169_v13 = vld [vmem:[#allocation7 + $0x28] sm:$0xff]  ;;  %p576_p6 = scmp.ne.s32.totalorder %s361_s25, %s575_s26  ;;  %p581_p8 = scmp.lt.s32.totalorder %s575_s26, %s575_s26 }
  0x38   :  { %419 = vmatpush3.msra.mxu1 %v178_v4  ;;  %451 = vmatprep.subr.mxu0 %v609_v0  ;;  %v168_v14 = vld [vmem:[#allocation7 + $0x20] sm:$0xff]  ;;  %v167_v15 = vld [vmem:[#allocation7 + $0x18] sm:$0xff]  ;;  %v166_v16 = vld [vmem:[#allocation7 + $0x10] sm:$0xff] }
  0x39   :  { %420 = vmatprep.subr.mxu1 %v609_v0  ;;  %483 = vmatprep.mubr.msk.f32.mxu0 %vm610_vm0, %v609_v0  ;;  %v165_v17 = vld [vmem:[#allocation7 + $0x8] sm:$0xff]  ;;  %v164_v18 = vld [vmem:[#allocation7] sm:$0xff]  ;;  %v275_v19 = vld [vmem:[#allocation8 + $0x78] sm:$0xff]  ;;  %p582_p9 = por %p581_p8, %p580_p7 }
  0x3a   :  { %421 = vmatpush3.msra.mxu1 %v177_v5  ;;  %v274_v20 = vld [vmem:[#allocation8 + $0x70] sm:$0xff]  ;;  %452 = vmatpush3.msra.mxu0 %v275_v19  ;;  %v273_v21 = vld [vmem:[#allocation8 + $0x68] sm:$0xff]  ;;  %v272_v22 = vld [vmem:[#allocation8 + $0x60] sm:$0xff] }
  0x3b   :  { %422 = vmatprep.subr.mxu1 %v609_v0  ;;  %453 = vmatprep.subr.mxu0 %v609_v0  ;;  %v271_v23 = vld [vmem:[#allocation8 + $0x58] sm:$0xff]  ;;  %v270_v24 = vld [vmem:[#allocation8 + $0x50] sm:$0xff]  ;;  %v269_v25 = vld [vmem:[#allocation8 + $0x48] sm:$0xff]  ;;  %p583_p10 = pnand %p582_p9, %p576_p6 }
  0x3c   :  { %423 = vmatpush3.msra.mxu1 %v176_v6  ;;  %454 = vmatpush3.msra.mxu0 %v274_v20  ;;  %v268_v26 = vld [vmem:[#allocation8 + $0x40] sm:$0xff]  ;;  %v267_v27 = vld [vmem:[#allocation8 + $0x38] sm:$0xff]  ;;  %v266_v28 = vld [vmem:[#allocation8 + $0x30] sm:$0xff] }
  0x3d   :  { %424 = vmatprep.subr.mxu1 %v609_v0  ;;  %455 = vmatprep.subr.mxu0 %v609_v0  ;;  %v265_v29 = vld [vmem:[#allocation8 + $0x28] sm:$0xff]  ;;  %v264_v30 = vld [vmem:[#allocation8 + $0x20] sm:$0xff]  ;;  %v263_v31 = vld [vmem:[#allocation8 + $0x18] sm:$0xff] }
  0x3e   :  { %425 = vmatpush3.msra.mxu1 %v175_v7  ;;  %456 = vmatpush3.msra.mxu0 %v273_v21  ;;  %v371_v32 = vld [vmem:[%s717_s2] ss:$0 sm:$0xff]  ;;  %v261_v39 = vld [vmem:[#allocation8 + $0x8] sm:$0xff]  ;;  %v260_v40 = vld [vmem:[#allocation8] sm:$0xff] }
  0x3f   :  { %426 = vmatprep.subr.mxu1 %v609_v0  ;;  %457 = vmatprep.subr.mxu0 %v609_v0  ;;  %v262_v38 = vld [vmem:[#allocation8 + $0x10] sm:$0xff] }
  0x40   :  { %427 = vmatpush3.msra.mxu1 %v174_v8  ;;  %458 = vmatpush3.msra.mxu0 %v272_v22  ;;  %v373_v41 = vld [vmem:[%s719_s4] ss:$0 sm:$0xff] }
  0x41   :  { %428 = vmatprep.subr.mxu1 %v609_v0  ;;  %459 = vmatprep.subr.mxu0 %v609_v0  ;;  %v374_v47 = vld [vmem:[%s721_s6] ss:$0 sm:$0xff] }
  0x42   :  { %429 = vmatpush3.msra.mxu1 %v173_v9  ;;  %460 = vmatpush3.msra.mxu0 %v271_v23 }
  0x43   :  { %430 = vmatprep.subr.mxu1 %v609_v0  ;;  %461 = vmatprep.subr.mxu0 %v609_v0 }
  0x44   :  { %431 = vmatpush3.msra.mxu1 %v172_v10  ;;  %462 = vmatpush3.msra.mxu0 %v270_v24 }
  0x45   :  { %432 = vmatprep.subr.mxu1 %v609_v0  ;;  %463 = vmatprep.subr.mxu0 %v609_v0 }
  0x46   :  { %433 = vmatpush3.msra.mxu1 %v171_v11  ;;  %464 = vmatpush3.msra.mxu0 %v269_v25 }
  0x47   :  { %434 = vmatprep.subr.mxu1 %v609_v0  ;;  %465 = vmatprep.subr.mxu0 %v609_v0 }
  0x48   :  { %435 = vmatpush3.msra.mxu1 %v170_v12  ;;  %466 = vmatpush3.msra.mxu0 %v268_v26 }
  0x49   :  { %436 = vmatprep.subr.mxu1 %v609_v0  ;;  %467 = vmatprep.subr.mxu0 %v609_v0 }
  0x4a   :  { %437 = vmatpush3.msra.mxu1 %v169_v13  ;;  %468 = vmatpush3.msra.mxu0 %v267_v27 }
  0x4b   :  { %438 = vmatprep.subr.mxu1 %v609_v0  ;;  %469 = vmatprep.subr.mxu0 %v609_v0 }
  0x4c   :  { %439 = vmatpush3.msra.mxu1 %v168_v14  ;;  %470 = vmatpush3.msra.mxu0 %v266_v28 }
  0x4d   :  { %440 = vmatprep.subr.mxu1 %v609_v0  ;;  %471 = vmatprep.subr.mxu0 %v609_v0 }
  0x4e   :  { %441 = vmatpush3.msra.mxu1 %v167_v15  ;;  %472 = vmatpush3.msra.mxu0 %v265_v29 }
  0x4f   :  { %442 = vmatprep.subr.mxu1 %v609_v0  ;;  %473 = vmatprep.subr.mxu0 %v609_v0 }
  0x50   :  { %443 = vmatpush3.msra.mxu1 %v166_v16  ;;  %474 = vmatpush3.msra.mxu0 %v264_v30 }
  0x51   :  { %444 = vmatprep.subr.mxu1 %v609_v0  ;;  %475 = vmatprep.subr.mxu0 %v609_v0 }
  0x52   :  { %445 = vmatpush3.msra.mxu1 %v165_v17  ;;  %476 = vmatpush3.msra.mxu0 %v263_v31 }
  0x53   :  { %446 = vmatprep.subr.mxu1 %v609_v0  ;;  %477 = vmatprep.subr.mxu0 %v609_v0 }
  0x54   :  { %447 = vmatpush3.msra.mxu1 %v164_v18  ;;  %478 = vmatpush3.msra.mxu0 %v262_v38 }
  0x55   :  { %479 = vmatprep.subr.mxu0 %v609_v0 }
  0x56   :  { %480 = vmatpush3.msra.mxu0 %v261_v39 }
  0x57   :  { %481 = vmatprep.subr.mxu0 %v609_v0 }
  0x58   :  { %482 = vmatpush3.msra.mxu0 %v260_v40 }
  0xf7   :  { %v157_v33 = vpop.f32.mrf.mxu0 }
  0xf8   :  { %v158_v34 = vadd.f32 %v371_v32, %v157_v33 }
  0xf9   :  { %v415_v35 = vpop.f32.mrf.mxu0 }
  0xfa   :  { %v162_v36 = vmul.f32 0.01, %v158_v34  ;;  %vm161_vm2 = vcmp.gt.f32.partialorder %v158_v34, 0.0 }
  0xfc   :  { %v163_v37 = vsel %vm161_vm2, %v158_v34, %v162_v36 }
  0xfd   :  { %449 = vmatmul.mubr.f32.vlgmr.msra.gmra.mxu1 %v163_v37 }
 0x1bd   :  { %v253_v42 = vpop.f32.mrf.mxu1 }
 0x1be   :  { %v254_v43 = vadd.f32 %v373_v41, %v253_v42 }
 0x1bf   :  { %v450_v44 = vpop.f32.mrf.mxu1 }
 0x1c0   :  { %vm257_vm3 = vcmp.gt.f32.partialorder %v254_v43, 0.0  ;;  %v258_v45 = vmul.f32 0.01, %v254_v43 }
 0x1c2   :  { %v259_v46 = vsel %vm257_vm3, %v254_v43, %v258_v45 }
 0x1c3   :  { %484 = vmatmul.mubr.f32.vlgmr.msra.gmra.mxu0 %v259_v46 }
 0x283   :  { %v349_v48 = vpop.f32.mrf.mxu0 }
 0x284   :  { %v350_v49 = vadd.f32 %v374_v47, %v349_v48 }
 0x285   :  { %v485_v50 = vpop.f32.mrf.mxu0 }
 0x286   :  { %353 = vst [vmem:[#allocation10] sm:$0xff] %v350_v49 }
 0x287   :  { %586 = shalt.err (!%p583_p10)
}
 0x288   :  { %363 = dma.vmem_to_hbm [thread:$0]  %s361_s25, 128, %s722_s7, [#allocation4]  }
 0x289   :  { %601 = dma.done.wait [#allocation4], 128  }
 0x28a   :  { %602 = vsyncadd [#allocation4], 4294967168 }
 0x28b   :  { %367 = vsyncpa [#allocation3], 1 }
 0x28c   :  { %368 = vsyncpa [#allocation6], 1 }
 0x28d   :  { %369 = vsyncpa [#allocation9], 1 }
 0x28e   :  { %370 = vsyncpa [#allocation4], 1 }

</bundles_post_ra>
